<compile_context>
chip_gen: v5e
topology: v5e:2x2
jax: 0.10.0
libtpu: 0.0.40
codegen_flags: <defaults>
</compile_context>

<pallas_src>
import math
import numpy as np
import jax
import jax.numpy as jnp
from jax.experimental import pallas as pl
from jax.experimental.pallas import tpu as pltpu


# ----------------------------------------------------------------------------
# Deterministic parameter construction (mirrors DWT_IDWT_layer.get_matrix).
# For 'haar': rec_lo = [1/sqrt(2), 1/sqrt(2)], rec_hi = [1/sqrt(2), -1/sqrt(2)]
# ----------------------------------------------------------------------------
def build_dwt_matrices(H, W, band_low, band_high, dtype=np.float32):
    band_length = len(band_low)
    band_length_half = band_length // 2
    L1 = max(H, W)
    L = math.floor(L1 / 2)

    matrix_h = np.zeros((L, L1 + band_length - 2), dtype=np.float64)
    matrix_g = np.zeros((L1 - L, L1 + band_length - 2), dtype=np.float64)
    end = None if band_length_half == 1 else (-band_length_half + 1)

    index = 0
    for i in range(L):
        for j in range(band_length):
            matrix_h[i, index + j] = band_low[j]
        index += 2
    matrix_h_0 = matrix_h[0:H // 2, 0:H + band_length - 2]
    matrix_h_1 = matrix_h[0:W // 2, 0:W + band_length - 2]

    index = 0
    for i in range(L1 - L):
        for j in range(band_length):
            matrix_g[i, index + j] = band_high[j]
        index += 2
    matrix_g_0 = matrix_g[0:H - H // 2, 0:H + band_length - 2]
    matrix_g_1 = matrix_g[0:W - W // 2, 0:W + band_length - 2]

    matrix_h_0 = matrix_h_0[:, band_length_half - 1:end]              # (H/2, H)
    matrix_h_1 = matrix_h_1[:, band_length_half - 1:end].T            # (W, W/2)
    matrix_g_0 = matrix_g_0[:, band_length_half - 1:end]              # (H/2, H)
    matrix_g_1 = matrix_g_1[:, band_length_half - 1:end].T            # (W, W/2)

    return (matrix_h_0.astype(dtype), matrix_h_1.astype(dtype),
            matrix_g_0.astype(dtype), matrix_g_1.astype(dtype))


# ----------------------------------------------------------------------------
# Batch-size (planes per grid step) heuristic.
# ----------------------------------------------------------------------------
def _pick_batch(NC, H, W, itemsize):
    """Largest divisor of NC such that blocks stay small (v7x: 64 MiB VMEM),
    the block-diagonal row filter stays modest, and the grid extent stays >= 2
    so both v7x TensorCores get work.  v5e/v6e are unaffected by the latter."""
    if H % 8 != 0:
        # (B, H, W) -> (B*H, W) reshape is only a free relayout when H % 8 == 0.
        return 1
    cap_mem = max(1, (4 << 20) // (H * W * itemsize))   # <= ~4 MiB per x block
    cap_kron = max(1, 1024 // H)                        # kron(I_B, F0) <= ~4 MiB
    cap = min(cap_mem, cap_kron)
    divs = [d for d in range(1, NC + 1) if NC % d == 0 and d <= cap]
    pref = [d for d in divs if NC // d >= 2]
    return max(pref) if pref else max(divs)


# ----------------------------------------------------------------------------
# Pallas kernel: B planes per grid step, 2 lane-dense MXU matmuls, one packed
# output block.  (For 'haar' specifically a pure-VPU 2x2 add/sub path would hit
# the HBM roofline; the matmul path below stays general over wavelets.)
# ----------------------------------------------------------------------------
def dwt2d_kernel(x_ref, f0bd_ref, f1_ref, out_ref):
    B, H, W = x_ref.shape
    xs = x_ref[...].reshape(B * H, W)            # stack planes along rows (free: H % 8 == 0 or B == 1)
    # Row pass for all B planes at once via the block-diagonal fused filter.
    r = jnp.dot(f0bd_ref[...], xs, preferred_element_type=jnp.float32)   # (B*H, W)
    # Column pass: one flat lane-dense matmul with the fused [lo1 | hi1] filter.
    z = jnp.dot(r, f1_ref[...], preferred_element_type=jnp.float32)      # (B*H, W)
    out_ref[...] = z.reshape(B, H, W).astype(out_ref.dtype)


def downsample_v1(x, lo0, lo1, hi0, hi1):
    """x: (N, C, H, W).  Returns (LL, LH, HL, HH), each (N, C, H/2, W/2)."""
    N, C, H, W = x.shape
    Hh, Wh = H // 2, W // 2
    NC = N * C
    x_flat = x.reshape(NC, H, W)

    # Fused filters (built once, outside the kernel).
    F0 = jnp.concatenate([lo0, hi0], axis=0)          # (H, H): rows = [low ; high]
    F1 = jnp.concatenate([lo1, hi1], axis=1)          # (W, W): cols = [low | high]

    B = _pick_batch(NC, H, W, x.dtype.itemsize)
    grid = NC // B
    # Block-diagonal row filter so the row pass over B stacked planes is ONE matmul.
    F0_bd = jnp.kron(jnp.eye(B, dtype=F0.dtype), F0)  # (B*H, B*H)

    packed = pl.pallas_call(
        dwt2d_kernel,
        out_shape=jax.ShapeDtypeStruct((NC, H, W), x.dtype),
        grid=(grid,),
        in_specs=[
            pl.BlockSpec((B, H, W), lambda i: (i, 0, 0)),       # x planes
            pl.BlockSpec((B * H, B * H), lambda i: (0, 0)),     # fused row filter (resident)
            pl.BlockSpec((W, W), lambda i: (0, 0)),             # fused column filter (resident)
        ],
        out_specs=pl.BlockSpec((B, H, W), lambda i: (i, 0, 0)),  # quadrant-packed result
        compiler_params=pltpu.CompilerParams(
            dimension_semantics=("parallel",)),
    )(x_flat, F0_bd, F1)

    packed = packed.reshape(N, C, H, W)
    LL = packed[:, :, :Hh, :Wh]
    LH = packed[:, :, :Hh, Wh:]
    HL = packed[:, :, Hh:, :Wh]
    HH = packed[:, :, Hh:, Wh:]
    return LL, LH, HL, HH


# ----------------------------------------------------------------------------
# Pure-JAX reference (matches the PyTorch DWTFunction_2D forward).
# ----------------------------------------------------------------------------
def downsample_v1_ref(x, lo0, lo1, hi0, hi1):
    L = jnp.einsum('ph,nchw->ncpw', lo0, x)
    Hh = jnp.einsum('ph,nchw->ncpw', hi0, x)
    LL = jnp.einsum('ncpw,wq->ncpq', L, lo1)
    LH = jnp.einsum('ncpw,wq->ncpq', L, hi1)
    HL = jnp.einsum('ncpw,wq->ncpq', Hh, lo1)
    HH = jnp.einsum('ncpw,wq->ncpq', Hh, hi1)
    return LL, LH, HL, HH


if __name__ == "__main__":
    N, C, H, W = 2, 4, 16, 16

    # Haar reconstruction filters (pywt rec_lo / rec_hi), built in-script.
    s = 1.0 / math.sqrt(2.0)
    band_low = [s, s]
    band_high = [s, -s]

    lo0_np, lo1_np, hi0_np, hi1_np = build_dwt_matrices(H, W, band_low, band_high)
    lo0, lo1 = jnp.asarray(lo0_np), jnp.asarray(lo1_np)
    hi0, hi1 = jnp.asarray(hi0_np), jnp.asarray(hi1_np)

    key = jax.random.PRNGKey(0)
    x = jax.random.normal(key, (N, C, H, W), dtype=jnp.float32)

    outs = downsample_v1(x, lo0, lo1, hi0, hi1)
    outs = jax.block_until_ready(outs)

    refs = downsample_v1_ref(x, lo0, lo1, hi0, hi1)
    for got, want in zip(outs, refs):
        np.testing.assert_allclose(np.asarray(got), np.asarray(want),
                                   rtol=1e-5, atol=1e-5)

    print("KERNEL_OK")
</pallas_src>

<mosaic_0001>
module attributes {stable_mosaic.version = 11 : i64} {
  func.func @dwt2d_kernel(%arg0: i32, %arg1: memref<4x16x16xf32, #tpu.memory_space<vmem>>, %arg2: memref<64x64xf32, #tpu.memory_space<vmem>>, %arg3: memref<16x16xf32, #tpu.memory_space<vmem>>, %arg4: memref<4x16x16xf32, #tpu.memory_space<vmem>>) attributes {dimension_semantics = [#tpu.dimension_semantics<parallel>], iteration_bounds = array<i64: 2>, scalar_prefetch = 0 : i64, scratch_operands = 0 : i64, tpu.core_type = #tpu.core_type<tc>, window_params = [{transform_indices = @transform_0, window_bounds = array<i64: 4, 16, 16>}, {pipeline_mode = #tpu.pipeline_mode<synchronous>, transform_indices = @transform_1, window_bounds = array<i64: 64, 64>}, {pipeline_mode = #tpu.pipeline_mode<synchronous>, transform_indices = @transform_2, window_bounds = array<i64: 16, 16>}, {transform_indices = @transform_3, window_bounds = array<i64: 4, 16, 16>}]} {
    %c0 = arith.constant 0 : index
    %c0_0 = arith.constant 0 : index
    %c0_1 = arith.constant 0 : index
    %0 = vector.load %arg1[%c0, %c0_0, %c0_1] : memref<4x16x16xf32, #tpu.memory_space<vmem>>, vector<4x16x16xf32>
    %1 = vector.shape_cast %0 : vector<4x16x16xf32> to vector<64x16xf32>
    %c0_2 = arith.constant 0 : index
    %c0_3 = arith.constant 0 : index
    %2 = vector.load %arg2[%c0_2, %c0_3] : memref<64x64xf32, #tpu.memory_space<vmem>>, vector<64x64xf32>
    %cst = arith.constant dense<0.000000e+00> : vector<64x16xf32>
    %3 = tpu.matmul %2, %1, %cst {dimension_numbers = #tpu.dot_dimension_numbers<[1], [0], [0], [1], [0, 0, 1, 1], [], []>} : vector<64x64xf32>, vector<64x16xf32>, vector<64x16xf32> -> vector<64x16xf32>
    %c0_4 = arith.constant 0 : index
    %c0_5 = arith.constant 0 : index
    %4 = vector.load %arg3[%c0_4, %c0_5] : memref<16x16xf32, #tpu.memory_space<vmem>>, vector<16x16xf32>
    %cst_6 = arith.constant dense<0.000000e+00> : vector<64x16xf32>
    %5 = tpu.matmul %3, %4, %cst_6 {dimension_numbers = #tpu.dot_dimension_numbers<[1], [0], [0], [1], [0, 0, 1, 1], [], []>} : vector<64x16xf32>, vector<16x16xf32>, vector<64x16xf32> -> vector<64x16xf32>
    %6 = vector.shape_cast %5 : vector<64x16xf32> to vector<4x16x16xf32>
    %c0_7 = arith.constant 0 : index
    %c0_8 = arith.constant 0 : index
    %c0_9 = arith.constant 0 : index
    %7 = vector.load %arg4[%c0_7, %c0_8, %c0_9] : memref<4x16x16xf32, #tpu.memory_space<vmem>>, vector<4x16x16xf32>
    tpu.vector_store %arg4[%c0_7, %c0_8, %c0_9], %6 {strides = array<i32>} : memref<4x16x16xf32, #tpu.memory_space<vmem>>, vector<4x16x16xf32>,
    return
  }
  func.func @transform_0(%arg0: i32) -> (i32, i32, i32) {
    %c0_i32 = arith.constant 0 : i32
    %c0_i32_0 = arith.constant 0 : i32
    %c0_i32_1 = arith.constant 0 : i32
    return %arg0, %c0_i32, %c0_i32_0 : i32, i32, i32
  }
  func.func @transform_1(%arg0: i32) -> (i32, i32) {
    %c0_i32 = arith.constant 0 : i32
    %c0_i32_0 = arith.constant 0 : i32
    %c0_i32_1 = arith.constant 0 : i32
    return %c0_i32, %c0_i32_0 : i32, i32
  }
  func.func @transform_2(%arg0: i32) -> (i32, i32) {
    %c0_i32 = arith.constant 0 : i32
    %c0_i32_0 = arith.constant 0 : i32
    %c0_i32_1 = arith.constant 0 : i32
    return %c0_i32, %c0_i32_0 : i32, i32
  }
  func.func @transform_3(%arg0: i32) -> (i32, i32, i32) {
    %c0_i32 = arith.constant 0 : i32
    %c0_i32_0 = arith.constant 0 : i32
    %c0_i32_1 = arith.constant 0 : i32
    return %arg0, %c0_i32, %c0_i32_0 : i32, i32, i32
  }
}

</mosaic_0001>

<bundles_post_ra>
// kernel: tpu_custom_call.1
= control target key start
LH: loop header
LB: loop body
LE: loop exit
PB: predicated region body
PF: predicated region fallthrough
CT: control target
= control target key end

     0   :  { %8 = vsyncpa [#allocation3], 0  ;;  %s981_s0 = inlined_call_operand.hbm [shape: f32[8,16,16], index: 0, kind: input, shape index: {}]   ;;  %s982_s1 = inlined_call_operand.hbm [shape: f32[64,64], index: 1, kind: input, shape index: {}]   ;;  %s983_s2 = inlined_call_operand.hbm [shape: f32[16,16], index: 2, kind: input, shape index: {}]   ;;  %s984_s3 = inlined_call_operand.hbm [shape: f32[8,16,16], index: 3, kind: output, shape index: {}]  }
   0x1   :  { %10 = vsyncpa [#allocation3 + $0x1], 0 }
   0x2   :  { %11 = vsyncpa [#allocation6], 0 }
   0x3   :  { %12 = vsyncpa [#allocation4], 0 }
   0x4   :  { %14 = vsyncpa [#allocation4 + $0x1], 0  ;;  %s803_s12 = smov 0   ;;  %s805_s13 = smov 0  }
   0x5   :  { %s807_s14 = smov 0   ;;  %s809_s15 = smov 0  }
   0x6 LB: > { %s824_s16 = sadd.s32 4294967295, %s775_s15   ;;  %s494_s17 = sadd.s32 4294967294, %s775_s15   ;;  %s775_s15 = sphi %s809_s15, %s994_s15   ;;  %s771_s14 = sphi %s807_s14, %s993_s14   ;;  %s767_s13 = sphi %s805_s13, %s992_s13   ;;  %s763_s12 = sphi %s803_s12, %s991_s12  }
   0x7   : > { %p40_p0 = scmp.ne.s32.totalorder %s767_s13, %s763_s12  ;;  %p41_p1 = scmp.eq.s32.totalorder %s824_s16, 0 }
   0x8   : > { %p106_p2 = scmp.eq.s32.totalorder %s824_s16, 1  ;;  %p112_p3 = scmp.eq.s32.totalorder %s494_s17, 1 }
   0x9   : > { %p833_p4 = por %p41_p1, %p40_p0  ;;  %p495_p5 = scmp.ge.s32.totalorder %s775_s15, 1 }
   0xa   : > { %p838_p6 = por %p112_p3, %p40_p0  ;;  %p119_p7 = scmp.lt.s32.totalorder %s775_s15, 3 }
   0xb   : > { %s130_s22 = sshll.u32 %s982_s1, 4  ;;  %s777_s24 = smov [#allocation5]   ;;  %s131_s22 = int_to_ptr.hbm [resolvable:$true] %s130_s22 }
   0xc   : > { %p846_p8 = pnand %p495_p5, %p119_p7  ;;  %s132_s25 = sshll.u32 %s777_s24, 4  ;;  %s133_s25 = int_to_ptr.vmem [resolvable:$true] %s132_s25 }
   0xd   : > { %s144_s28 = sshll.u32 %s983_s2, 4  ;;  %s778_s29 = smov 128   ;;  %s145_s28 = int_to_ptr.hbm [resolvable:$true] %s144_s28 }
   0xe   : > { %p556_p9 = pneg %p846_p8  ;;  %s779_s30 = smov 8  }
   0xf   : > { %s780_s4 = smov [#allocation7]   ;;  %s865_s6 = sadd.s32 1, %s775_s15  }
  0x10   : > { %p557_p10 = pnand %p556_p9, %p41_p1  ;;  %s146_s5 = sshll.u32 %s780_s4, 4  ;;  %s147_s5 = int_to_ptr.vmem [resolvable:$true] %s146_s5 }
  0x11   : > { %s27_s7 = sadd.s32 1, %s771_s14  ;;  %s24_s8 = ssub.s32 %s775_s15, %s865_s6 }
  0x12   : > { %559 = dma.hbm_to_vmem [thread:$0]  (!%p557_p10), %s131_s22, 1024, %s133_s25, [#allocation6], %s778_s29, %s778_s29, %s779_s30  }
  0x13   : > { %562 = dma.hbm_to_vmem [thread:$0]  (!%p557_p10), %s145_s28, 256, %s147_s5, [#allocation6], %s778_s29, %s778_s29, %s779_s30  }
  0x14   : > { %p34_p12 = scmp.ne.s32.totalorder %s771_s14, %s767_s13  ;;  %p25_p13 = scmp.eq.s32.totalorder %s24_s8, 0 }
  0x15   : > { %p35_p0 = scmp.eq.s32.totalorder %s775_s15, 0  ;;  %p573_p5 = scmp.lt.s32.totalorder %s775_s15, 2 }
  0x16   : > { %p875_p3 = por %p106_p2, %p34_p12  ;;  %s160_s11 = sand.u32 1, %s771_s14  }
  0x17   : > { %s881_s10 = scalar_select %p25_p13, %s771_s14, %s27_s7  }
  0x18   : > { %p36_p7 = por %p35_p0, %p34_p12  ;;  %s499_s17 = sshll.u32 %s160_s11, 6 }
  0x19   : > { %s531_s20 = sshll.u32 %s775_s15, 6  ;;  %s164_s25 = scalar_lea.vmem [#allocation2], %s499_s17 }
  0x1a   : > { %s170_s24 = scalar_lea.hbm %s981_s0, %s531_s20  ;;  %s173_s26 = sshll.u32 %s164_s25, 4  ;;  %s174_s26 = int_to_ptr.vmem [resolvable:$true] %s173_s26 }
  0x1b   : > { %s171_s27 = sshll.u32 %s170_s24, 4  ;;  %p888_p2 = pnand %p573_p5, %p36_p7  ;;  %s172_s27 = int_to_ptr.hbm [resolvable:$true] %s171_s27 }
  0x1c   : > { %s161_s4 = scalar_lea.sflag [#allocation3], %s160_s11  ;;  %s675_s5 = sshra.s32 %s172_s27, 4  ;;  %s676_s5 = int_to_ptr.hbm [resolvable:$true] %s675_s5 }
  0x1d   : > { %s677_s7 = scalar_lea.hbm %s676_s5, 64  ;;  %p679_p10 = pneg %p888_p2 }
  0x1e   : > { %p678_p9 = scmp.ne.s32.totalorder %s676_s5, %s677_s7  ;;  %s682_s20 = scalar_lea.hbm %s981_s0, 128 }
  0x1f   : > { %p683_p0 = scmp.lt.s32.totalorder %s676_s5, %s981_s0  ;;  %p684_p5 = scmp.lt.s32.totalorder %s682_s20, %s677_s7 }
  0x20   : > { %p680_p12 = pnand %p679_p10, %p678_p9 }
  0x21   : > { %p685_p7 = por %p684_p5, %p683_p0 }
  0x22   : > { %p681_p13 = pneg %p680_p12 }
  0x24   : > { %p686_p11 = pnand %p685_p7, %p681_p13 }
  0x26   : > { %689 = shalt.err (!%p686_p11)
}
  0x27   : > { %566 = dma.hbm_to_vmem [thread:$0]  (!%p888_p2), %s172_s27, 1024, %s174_s26, %s161_s4, %s778_s29, %s778_s29, %s779_s30  }
  0x28   : > { %185 = sbr.rel (%p846_p8) target bundleno = 356 (0x164), region = 32  ;;  %s908_s11 = sand.u32 (!%p846_p8), 1, %s767_s13  }
  0x29   : > { %s504_s24 = sshll.u32 (!%p846_p8), %s908_s11, 6  ;;  %s188_s25 = scalar_lea.sflag (!%p846_p8), [#allocation3], %s908_s11 }
  0x2a   : > { %s191_s5 = scalar_lea.vmem (!%p846_p8), [#allocation2], %s504_s24 }
  0x2d   : > { %750 = dma.done.wait (%p833_p4), %s188_s25, 1024  }
  0x2e   : > { %752 = vsyncadd (%p833_p4), %s188_s25, 4294966272 }
  0x2f   : > { %754 = dma.done.wait (%p41_p1), [#allocation6], 1280  }
  0x30   : > { %756 = vsyncadd (%p41_p1), [#allocation6], 4294966016  ;;  %v234_v0 = vld [vmem:[%s191_s5 + $0x38] sm:$0xff]  ;;  %v233_v1 = vld [vmem:[%s191_s5 + $0x30] sm:$0xff]  ;;  %vm243_vm0 = vcmask 523264   ;;  %vm311_vm1 = vcmask 130048  }
  0x31   : > { %276 = vmatpush.msra.mxu0 %v234_v0  ;;  %534 = vmatpush.msra.mxu2 %v234_v0  ;;  %v232_v2 = vld [vmem:[%s191_s5 + $0x28] sm:$0xff]  ;;  %v231_v3 = vld [vmem:[%s191_s5 + $0x20] sm:$0xff]  ;;  %v230_v4 = vld [vmem:[%s191_s5 + $0x18] sm:$0xff]  ;;  %s224_s18 = scalar_lea.vmem [#allocation8], %s504_s24  ;;  %s533_s23 = sshll.u32 %s824_s16, 6 }
  0x32   : > { %v229_v5 = vld [vmem:[%s191_s5 + $0x10] sm:$0xff]  ;;  %v310_v6 = vld [vmem:[#allocation7 + $0x8] sm:$0xff]  ;;  %v227_v8 = vld [vmem:[%s191_s5] sm:$0xff]  ;;  %s398_s26 = scalar_lea.hbm %s984_s3, %s533_s23  ;;  %s399_s27 = sshll.u32 %s224_s18, 4  ;;  %s400_s27 = int_to_ptr.vmem [resolvable:$true] %s399_s27 }
  0x33   : > { %277 = vmatpush.msra.mxu0 %v233_v1  ;;  %535 = vmatpush.msra.mxu2 %v233_v1  ;;  %v228_v7 = vld [vmem:[%s191_s5 + $0x8] sm:$0xff]  ;;  %v235_v9 = vld [vmem:[#allocation5] sm:$0xff]  ;;  %v237_v13 = vld [vmem:[#allocation5 + $0x10] sm:$0xff]  ;;  %s401_s28 = sshll.u32 %s398_s26, 4  ;;  %s386_s4 = scalar_lea.sflag [#allocation4], %s908_s11  ;;  %s402_s28 = int_to_ptr.hbm [resolvable:$true] %s401_s28 }
  0x34   : > { %350 = vmatpush.msra.mxu1 %v310_v6  ;;  %542 = vmatpush.msra.mxu3 %v310_v6  ;;  %v239_v10 = vld [vmem:[#allocation5 + $0x20] sm:$0xff]  ;;  %v236_v11 = vld [vmem:[#allocation5 + $0x8] sm:$0xff]  ;;  %v241_v14 = vld [vmem:[#allocation5 + $0x30] sm:$0xff]  ;;  %s719_s16 = sshra.s32 %s402_s28, 4  ;;  %s725_s20 = scalar_lea.hbm %s984_s3, 128  ;;  %s720_s16 = int_to_ptr.hbm [resolvable:$true] %s719_s16 }
  0x35   : > { %278 = vmatpush.msra.mxu0 %v232_v2  ;;  %536 = vmatpush.msra.mxu2 %v232_v2  ;;  %v240_v12 = vld [vmem:[#allocation5 + $0x28] sm:$0xff]  ;;  %v238_v15 = vld [vmem:[#allocation5 + $0x18] sm:$0xff]  ;;  %v309_v17 = vld [vmem:[#allocation7] sm:$0xff]  ;;  %s721_s7 = scalar_lea.hbm %s720_s16, 64  ;;  %p726_p11 = scmp.lt.s32.totalorder %s720_s16, %s984_s3 }
  0x36   : > { %v242_v16 = vld [vmem:[#allocation5 + $0x38] sm:$0xff]  ;;  %351 = vmatpush.msra.mxu1 %v309_v17  ;;  %543 = vmatpush.msra.mxu3 %v309_v17  ;;  %p722_p1 = scmp.ne.s32.totalorder %s720_s16, %s721_s7  ;;  %p727_p2 = scmp.lt.s32.totalorder %s725_s20, %s721_s7 }
  0x37   : > { %279 = vmatpush.msra.mxu0 %v231_v3  ;;  %537 = vmatpush.msra.mxu2 %v231_v3 }
  0x38   : > { %p723_p4 = pnand %p722_p1, %p875_p3  ;;  %p728_p9 = por %p727_p2, %p726_p11 }
  0x39   : > { %280 = vmatpush.msra.mxu0 %v230_v4  ;;  %538 = vmatpush.msra.mxu2 %v230_v4 }
  0x3a   : > { %p724_p8 = pneg %p723_p4 }
  0x3b   : > { %281 = vmatpush.msra.mxu0 %v229_v5  ;;  %539 = vmatpush.msra.mxu2 %v229_v5 }
  0x3c   : > { %p729_p10 = pnand %p728_p9, %p724_p8 }
  0x3d   : > { %282 = vmatpush.msra.mxu0 %v228_v7  ;;  %540 = vmatpush.msra.mxu2 %v228_v7 }
  0x3f   : > { %283 = vmatpush.msra.mxu0 %v227_v8  ;;  %541 = vmatpush.msra.mxu2 %v227_v8 }
  0x40   : > { %508 = vmatmul.msk.f32.vlgmr.msra.gmra.mxu0 %vm243_vm0, %v235_v9  ;;  %512 = vmatmul.msk.f32.vlgmr.msra.gmra.mxu2 %vm243_vm0, %v239_v10 }
  0x48   : > { %509 = vmatmul.msk.f32.gmra.mxu0 %vm243_vm0, %v236_v11  ;;  %513 = vmatmul.msk.f32.gmra.mxu2 %vm243_vm0, %v240_v12 }
  0x50   : > { %510 = vmatmul.msk.f32.gmra.mxu0 %vm243_vm0, %v237_v13  ;;  %514 = vmatmul.msk.f32.gmra.mxu2 %vm243_vm0, %v241_v14 }
  0x58   : > { %511 = vmatmul.msk.f32.gmra.mxu0 %vm243_vm0, %v238_v15  ;;  %515 = vmatmul.msk.f32.gmra.mxu2 %vm243_vm0, %v242_v16 }
  0xbd   : > { %v285_v18 = vpop.f32.mrf.mxu0 }
  0xbe   : > { %516 = vmatmul.msk.f32.vlgmr.msra.gmra.mxu1 %vm311_vm1, %v285_v18 }
  0xc3   : > { %v297_v19 = vpop.f32.mrf.mxu2 }
  0xc5   : > { %v288_v20 = vpop.f32.mrf.mxu0 }
  0xc6   : > { %517 = vmatmul.msk.f32.gmra.mxu1 %vm311_vm1, %v288_v20 }
  0xcb   : > { %v300_v21 = vpop.f32.mrf.mxu2 }
  0xcc   : > { %521 = vmatmul.msk.f32.vlgmr.msra.gmra.mxu3 %vm311_vm1, %v300_v21 }
  0xcd   : > { %v291_v22 = vpop.f32.mrf.mxu0 }
  0xce   : > { %518 = vmatmul.msk.f32.gmra.mxu1 %vm311_vm1, %v291_v22 }
  0xd3   : > { %v303_v23 = vpop.f32.mrf.mxu2 }
  0xd4   : > { %522 = vmatmul.msk.f32.gmra.mxu3 %vm311_vm1, %v303_v23 }
  0xd5   : > { %v294_v24 = vpop.f32.mrf.mxu0 }
  0xd6   : > { %519 = vmatmul.msk.f32.gmra.mxu1 %vm311_vm1, %v294_v24 }
  0xdb   : > { %v306_v25 = vpop.f32.mrf.mxu2 }
  0xdc   : > { %523 = vmatmul.msk.f32.gmra.mxu3 %vm311_vm1, %v306_v25 }
  0xde   : > { %520 = vmatmul.msk.f32.gmra.mxu1 %vm311_vm1, %v297_v19 }
 0x13b   : > { %v353_v26 = vpop.f32.mrf.mxu1 }
 0x13c   : > { %377 = vst.msk [vmem:[%s224_s18] sm:$0xff] %vm311_vm1, %v353_v26 }
 0x143   : > { %v356_v27 = vpop.f32.mrf.mxu1 }
 0x144   : > { %378 = vst.msk [vmem:[%s224_s18 + $0x8] sm:$0xff] %vm311_vm1, %v356_v27 }
 0x14b   : > { %v359_v28 = vpop.f32.mrf.mxu1 }
 0x14c   : > { %379 = vst.msk [vmem:[%s224_s18 + $0x10] sm:$0xff] %vm311_vm1, %v359_v28 }
 0x14f   : > { %v368_v29 = vpop.f32.mrf.mxu3 }
 0x150   : > { %382 = vst.msk [vmem:[%s224_s18 + $0x28] sm:$0xff] %vm311_vm1, %v368_v29 }
 0x153   : > { %v362_v30 = vpop.f32.mrf.mxu1 }
 0x154   : > { %380 = vst.msk [vmem:[%s224_s18 + $0x18] sm:$0xff] %vm311_vm1, %v362_v30 }
 0x157   : > { %v371_v31 = vpop.f32.mrf.mxu3 }
 0x158   : > { %383 = vst.msk [vmem:[%s224_s18 + $0x30] sm:$0xff] %vm311_vm1, %v371_v31 }
 0x15b   : > { %v365_v32 = vpop.f32.mrf.mxu1 }
 0x15c   : > { %381 = vst.msk [vmem:[%s224_s18 + $0x20] sm:$0xff] %vm311_vm1, %v365_v32 }
 0x15f   : > { %v374_v33 = vpop.f32.mrf.mxu3 }
 0x160   : > { %384 = vst.msk [vmem:[%s224_s18 + $0x38] sm:$0xff] %vm311_vm1, %v374_v33 }
 0x161   : > { %732 = shalt.err (!%p729_p10)
}
 0x162   : > { %s781_s11 = smov 128   ;;  %s782_s24 = smov 8  }
 0x163   : > { %554 = dma.vmem_to_hbm [thread:$0]  (%p875_p3), %s400_s27, 1024, %s402_s28, %s386_s4, %s781_s11, %s781_s11, %s782_s24  }
 0x164 PF: > { %s416_s25 = sand.u32 1, %s763_s12   ;;  %p990_p12 = scmp.ge.s32.totalorder %s775_s15, 2 }
 0x165   : > { %s417_s5 = scalar_lea.sflag [#allocation4], %s416_s25 }
 0x166   : > { %p568_p13 = pnand %p990_p12, %p838_p6 }
 0x168   : > { %p569_p0 = pneg %p568_p13 }
 0x16a   : > { %758 = dma.done.wait (%p569_p0), %s417_s5, 1024  }
 0x16b   : > { %760 = vsyncadd (%p569_p0), %s417_s5, 4294966272  ;;  %p17_p5 = scmp.ge.s32.totalorder %s865_s6, 4   ;;  %s991_s12 = smov %s767_s13 }
 0x16c   : > { %s992_s13 = smov %s771_s14  ;;  %s993_s14 = smov %s881_s10 }
 0x16d   : > { %s994_s15 = smov %s865_s6  ;;  %19 = sbr.rel (!%p17_p5) target bundleno = 6 (0x6), region = 85 }
 0x172   :  { %423 = vsyncpa [#allocation3], 1 }
 0x173   :  { %425 = vsyncpa [#allocation3 + $0x1], 1 }
 0x174   :  { %426 = vsyncpa [#allocation6], 1 }
 0x175   :  { %427 = vsyncpa [#allocation4], 1 }
 0x176   :  { %429 = vsyncpa [#allocation4 + $0x1], 1 }

</bundles_post_ra>
